<compile_context>
chip_gen: v7x
topology: tpu7x:2x2x1
jax: 0.10.0
libtpu: 0.0.40
codegen_flags: <defaults>
</compile_context>

<pallas_src>
import jax
import jax.numpy as jnp
from jax.experimental import pallas as pl
from jax.experimental.pallas import tpu as pltpu

HIDDEN = 256
LANE = 128        # lane width: pad action dim to this for lane-dense stores
K_ALIGN = 16      # bf16 sublane packing: pad obs (K of fc1) to a multiple of this
SUBLANE = 8       # f32 sublane width (batch-tile granularity)


def _round_up(n, m):
    return ((n + m - 1) // m) * m


def actor_kernel(x_ref, w1_ref, b1_ref, w2_ref, b2_ref, w3_ref, b3_ref,
                 scale_ref, bias_ref, out_ref):
    # Matmul operands in bf16 (MXU native, halved weight DMA), f32 accumulate.
    # Elementwise / transcendental work stays f32 for v5e compatibility.
    x = x_ref[...]                                                      # [TB, obs_pad] f32
    h1 = jnp.dot(x.astype(jnp.bfloat16), w1_ref[...],
                 preferred_element_type=jnp.float32)                    # [TB, 256]
    h1 = jnp.maximum(h1 + b1_ref[...], 0.0)
    h2 = jnp.dot(h1.astype(jnp.bfloat16), w2_ref[...],
                 preferred_element_type=jnp.float32)                    # [TB, 256]
    h2 = jnp.maximum(h2 + b2_ref[...], 0.0)
    mu = jnp.dot(h2.astype(jnp.bfloat16), w3_ref[...],
                 preferred_element_type=jnp.float32)                    # [TB, act_pad]
    mu = jnp.tanh(mu + b3_ref[...])
    out_ref[...] = mu * scale_ref[...] + bias_ref[...]


def actor_forward(x, params, act_dim, *, batch_tile=128):
    """x: [B, obs_dim] f32. Returns [B, act_dim] f32."""
    w1, b1, w2, b2, w3, b3, scale, bias = params
    B, obs_dim = x.shape
    obs_pad = w1.shape[0]
    act_pad = w3.shape[1]

    # Pad features to the padded K of w1 and batch to a tile multiple.
    tile = min(batch_tile, _round_up(max(B, 1), SUBLANE))
    b_pad = _round_up(B, tile)
    x_pad = jnp.zeros((b_pad, obs_pad), jnp.float32).at[:B, :obs_dim].set(x)
    n_tiles = b_pad // tile

    flops = int(2 * b_pad * (obs_pad * HIDDEN + HIDDEN * HIDDEN + HIDDEN * act_pad))
    bytes_accessed = int(
        x_pad.size * 4 + b_pad * act_pad * 4
        + sum(a.size * a.dtype.itemsize
              for a in (w1, b1, w2, b2, w3, b3, scale, bias)))
    cost = pl.CostEstimate(flops=flops,
                           transcendentals=int(b_pad * act_pad),
                           bytes_accessed=bytes_accessed)

    # Weights/biases: constant index_map -> DMA'd once, resident across grid steps.
    const = lambda a: pl.BlockSpec(a.shape, lambda i: (0,) * a.ndim)

    out = pl.pallas_call(
        actor_kernel,
        out_shape=jax.ShapeDtypeStruct((b_pad, act_pad), jnp.float32),
        grid_spec=pltpu.PrefetchScalarGridSpec(
            num_scalar_prefetch=0,
            grid=(n_tiles,),
            in_specs=[
                pl.BlockSpec((tile, obs_pad), lambda i: (i, 0)),   # x: tiled on batch
                const(w1), const(b1),
                const(w2), const(b2),
                const(w3), const(b3),
                const(scale), const(bias),
            ],
            out_specs=pl.BlockSpec((tile, act_pad), lambda i: (i, 0)),
        ),
        compiler_params=pltpu.CompilerParams(
            dimension_semantics=("parallel",)),   # shard batch across TCs on v7x
        cost_estimate=cost,
    )(x_pad, w1, b1, w2, b2, w3, b3, scale, bias)

    return out[:B, :act_dim]


def init_params(key, obs_dim, act_dim, hidden=HIDDEN,
                action_low=-2.0, action_high=2.0):
    """Deterministic init mimicking nn.Linear's U(-1/sqrt(fan_in), 1/sqrt(fan_in)).

    Weight matrices are stored bf16 (matmul operands); biases / scale / bias stay f32.
    w1 is zero-padded on the obs axis, w3/b3/scale/bias on the action axis (lane-dense).
    """
    ks = jax.random.split(key, 6)
    obs_pad = _round_up(obs_dim, K_ALIGN)
    act_pad = _round_up(act_dim, LANE)

    def linear(kw, kb, fan_in, fan_out):
        bound = 1.0 / jnp.sqrt(jnp.float32(fan_in))
        w = jax.random.uniform(kw, (fan_in, fan_out), jnp.float32, -bound, bound)
        b = jax.random.uniform(kb, (1, fan_out), jnp.float32, -bound, bound)
        return w, b

    w1, b1 = linear(ks[0], ks[1], obs_dim, hidden)
    w2, b2 = linear(ks[2], ks[3], hidden, hidden)
    w3, b3 = linear(ks[4], ks[5], hidden, act_dim)

    w1p = jnp.zeros((obs_pad, hidden), jnp.float32).at[:obs_dim].set(w1)
    w3p = jnp.zeros((hidden, act_pad), jnp.float32).at[:, :act_dim].set(w3)
    b3p = jnp.zeros((1, act_pad), jnp.float32).at[:, :act_dim].set(b3)

    # action space: low = -2, high = 2  ->  scale = 2, bias = 0 (padded lanes = 0)
    scale = jnp.zeros((1, act_pad), jnp.float32).at[:, :act_dim].set(
        (action_high - action_low) / 2.0)
    bias = jnp.zeros((1, act_pad), jnp.float32).at[:, :act_dim].set(
        (action_high + action_low) / 2.0)

    return (w1p.astype(jnp.bfloat16), b1,
            w2.astype(jnp.bfloat16), b2,
            w3p.astype(jnp.bfloat16), b3p,
            scale, bias)


def actor_reference(x, params, act_dim):
    """Pure-JAX reference mirroring the kernel's bf16-operand / f32-accumulate dots."""
    w1, b1, w2, b2, w3, b3, scale, bias = params
    obs_pad = w1.shape[0]
    xp = jnp.zeros((x.shape[0], obs_pad), jnp.float32).at[:, :x.shape[1]].set(x)

    def bf16_dot(a, w):
        return jnp.dot(a.astype(jnp.bfloat16), w, preferred_element_type=jnp.float32)

    h1 = jax.nn.relu(bf16_dot(xp, w1) + b1)
    h2 = jax.nn.relu(bf16_dot(h1, w2) + b2)
    mu = jnp.tanh(bf16_dot(h2, w3) + b3)
    return (mu * scale + bias)[:, :act_dim]


if __name__ == "__main__":
    key = jax.random.PRNGKey(0)
    k_x, k_p = jax.random.split(key)

    # Vectorized-env-style batch so the MXU rows are actually used; still tiny overall.
    B, OBS_DIM, ACT_DIM = 256, 17, 6
    x = jax.random.normal(k_x, (B, OBS_DIM), jnp.float32)
    params = init_params(k_p, OBS_DIM, ACT_DIM)

    out = actor_forward(x, params, ACT_DIM, batch_tile=128)
    out = jax.block_until_ready(out)

    ref = actor_reference(x, params, ACT_DIM)
    assert out.shape == (B, ACT_DIM)
    assert bool(jnp.allclose(out, ref, atol=1e-2, rtol=1e-2)), "mismatch vs JAX reference"

    print("KERNEL_OK")
</pallas_src>

<mosaic_0001>
module attributes {stable_mosaic.version = 11 : i64} {
  func.func @actor_kernel(%arg0: i32, %arg1: memref<128x32xf32, #tpu.memory_space<vmem>>, %arg2: memref<32x256xbf16, #tpu.memory_space<vmem>>, %arg3: memref<1x256xf32, #tpu.memory_space<vmem>>, %arg4: memref<256x256xbf16, #tpu.memory_space<vmem>>, %arg5: memref<1x256xf32, #tpu.memory_space<vmem>>, %arg6: memref<256x128xbf16, #tpu.memory_space<vmem>>, %arg7: memref<1x128xf32, #tpu.memory_space<vmem>>, %arg8: memref<1x128xf32, #tpu.memory_space<vmem>>, %arg9: memref<1x128xf32, #tpu.memory_space<vmem>>, %arg10: memref<128x128xf32, #tpu.memory_space<vmem>>) attributes {dimension_semantics = [#tpu.dimension_semantics<parallel>], iteration_bounds = array<i64: 2>, scalar_prefetch = 0 : i64, scratch_operands = 0 : i64, tpu.core_type = #tpu.core_type<tc>, window_params = [{transform_indices = @transform_0, window_bounds = array<i64: 128, 32>}, {pipeline_mode = #tpu.pipeline_mode<synchronous>, transform_indices = @transform_1, window_bounds = array<i64: 32, 256>}, {pipeline_mode = #tpu.pipeline_mode<synchronous>, transform_indices = @transform_2, window_bounds = array<i64: 1, 256>}, {pipeline_mode = #tpu.pipeline_mode<synchronous>, transform_indices = @transform_3, window_bounds = array<i64: 256, 256>}, {pipeline_mode = #tpu.pipeline_mode<synchronous>, transform_indices = @transform_4, window_bounds = array<i64: 1, 256>}, {pipeline_mode = #tpu.pipeline_mode<synchronous>, transform_indices = @transform_5, window_bounds = array<i64: 256, 128>}, {pipeline_mode = #tpu.pipeline_mode<synchronous>, transform_indices = @transform_6, window_bounds = array<i64: 1, 128>}, {pipeline_mode = #tpu.pipeline_mode<synchronous>, transform_indices = @transform_7, window_bounds = array<i64: 1, 128>}, {pipeline_mode = #tpu.pipeline_mode<synchronous>, transform_indices = @transform_8, window_bounds = array<i64: 1, 128>}, {transform_indices = @transform_9, window_bounds = array<i64: 128, 128>}]} {
    %c0 = arith.constant 0 : index
    %c0_0 = arith.constant 0 : index
    %0 = vector.load %arg1[%c0, %c0_0] : memref<128x32xf32, #tpu.memory_space<vmem>>, vector<128x32xf32>
    %1 = arith.truncf %0 : vector<128x32xf32> to vector<128x32xbf16>
    %c0_1 = arith.constant 0 : index
    %c0_2 = arith.constant 0 : index
    %2 = vector.load %arg2[%c0_1, %c0_2] : memref<32x256xbf16, #tpu.memory_space<vmem>>, vector<32x256xbf16>
    %cst = arith.constant dense<0.000000e+00> : vector<128x256xf32>
    %3 = tpu.matmul %1, %2, %cst {dimension_numbers = #tpu.dot_dimension_numbers<[1], [0], [0], [1], [0, 0, 1, 1], [], []>} : vector<128x32xbf16>, vector<32x256xbf16>, vector<128x256xf32> -> vector<128x256xf32>
    %c0_3 = arith.constant 0 : index
    %c0_4 = arith.constant 0 : index
    %4 = vector.load %arg3[%c0_3, %c0_4] : memref<1x256xf32, #tpu.memory_space<vmem>>, vector<1x256xf32>
    %5 = vector.broadcast %4 : vector<1x256xf32> to vector<128x256xf32>
    %6 = arith.addf %3, %5 : vector<128x256xf32>
    %cst_5 = arith.constant 0.000000e+00 : f32
    %7 = vector.broadcast %cst_5 : f32 to vector<128x256xf32>
    %8 = arith.maximumf %6, %7 : vector<128x256xf32>
    %9 = arith.truncf %8 : vector<128x256xf32> to vector<128x256xbf16>
    %c0_6 = arith.constant 0 : index
    %c0_7 = arith.constant 0 : index
    %10 = vector.load %arg4[%c0_6, %c0_7] : memref<256x256xbf16, #tpu.memory_space<vmem>>, vector<256x256xbf16>
    %cst_8 = arith.constant dense<0.000000e+00> : vector<128x256xf32>
    %11 = tpu.matmul %9, %10, %cst_8 {dimension_numbers = #tpu.dot_dimension_numbers<[1], [0], [0], [1], [0, 0, 1, 1], [], []>} : vector<128x256xbf16>, vector<256x256xbf16>, vector<128x256xf32> -> vector<128x256xf32>
    %c0_9 = arith.constant 0 : index
    %c0_10 = arith.constant 0 : index
    %12 = vector.load %arg5[%c0_9, %c0_10] : memref<1x256xf32, #tpu.memory_space<vmem>>, vector<1x256xf32>
    %13 = vector.broadcast %12 : vector<1x256xf32> to vector<128x256xf32>
    %14 = arith.addf %11, %13 : vector<128x256xf32>
    %cst_11 = arith.constant 0.000000e+00 : f32
    %15 = vector.broadcast %cst_11 : f32 to vector<128x256xf32>
    %16 = arith.maximumf %14, %15 : vector<128x256xf32>
    %17 = arith.truncf %16 : vector<128x256xf32> to vector<128x256xbf16>
    %c0_12 = arith.constant 0 : index
    %c0_13 = arith.constant 0 : index
    %18 = vector.load %arg6[%c0_12, %c0_13] : memref<256x128xbf16, #tpu.memory_space<vmem>>, vector<256x128xbf16>
    %cst_14 = arith.constant dense<0.000000e+00> : vector<128x128xf32>
    %19 = tpu.matmul %17, %18, %cst_14 {dimension_numbers = #tpu.dot_dimension_numbers<[1], [0], [0], [1], [0, 0, 1, 1], [], []>} : vector<128x256xbf16>, vector<256x128xbf16>, vector<128x128xf32> -> vector<128x128xf32>
    %c0_15 = arith.constant 0 : index
    %c0_16 = arith.constant 0 : index
    %20 = vector.load %arg7[%c0_15, %c0_16] : memref<1x128xf32, #tpu.memory_space<vmem>>, vector<1x128xf32>
    %21 = vector.broadcast %20 : vector<1x128xf32> to vector<128x128xf32>
    %22 = arith.addf %19, %21 : vector<128x128xf32>
    %23 = math.tanh %22 : vector<128x128xf32>
    %c0_17 = arith.constant 0 : index
    %c0_18 = arith.constant 0 : index
    %24 = vector.load %arg8[%c0_17, %c0_18] : memref<1x128xf32, #tpu.memory_space<vmem>>, vector<1x128xf32>
    %25 = vector.broadcast %24 : vector<1x128xf32> to vector<128x128xf32>
    %26 = arith.mulf %23, %25 : vector<128x128xf32>
    %c0_19 = arith.constant 0 : index
    %c0_20 = arith.constant 0 : index
    %27 = vector.load %arg9[%c0_19, %c0_20] : memref<1x128xf32, #tpu.memory_space<vmem>>, vector<1x128xf32>
    %28 = vector.broadcast %27 : vector<1x128xf32> to vector<128x128xf32>
    %29 = arith.addf %26, %28 : vector<128x128xf32>
    %c0_21 = arith.constant 0 : index
    %c0_22 = arith.constant 0 : index
    %30 = vector.load %arg10[%c0_21, %c0_22] : memref<128x128xf32, #tpu.memory_space<vmem>>, vector<128x128xf32>
    tpu.vector_store %arg10[%c0_21, %c0_22], %29 {strides = array<i32>} : memref<128x128xf32, #tpu.memory_space<vmem>>, vector<128x128xf32>,
    return
  }
  func.func @transform_0(%arg0: i32) -> (i32, i32) {
    %c0_i32 = arith.constant 0 : i32
    %c0_i32_0 = arith.constant 0 : i32
    return %arg0, %c0_i32 : i32, i32
  }
  func.func @transform_1(%arg0: i32) -> (i32, i32) {
    %c0_i32 = arith.constant 0 : i32
    %c0_i32_0 = arith.constant 0 : i32
    %c0_i32_1 = arith.constant 0 : i32
    return %c0_i32, %c0_i32_0 : i32, i32
  }
  func.func @transform_2(%arg0: i32) -> (i32, i32) {
    %c0_i32 = arith.constant 0 : i32
    %c0_i32_0 = arith.constant 0 : i32
    %c0_i32_1 = arith.constant 0 : i32
    return %c0_i32, %c0_i32_0 : i32, i32
  }
  func.func @transform_3(%arg0: i32) -> (i32, i32) {
    %c0_i32 = arith.constant 0 : i32
    %c0_i32_0 = arith.constant 0 : i32
    %c0_i32_1 = arith.constant 0 : i32
    return %c0_i32, %c0_i32_0 : i32, i32
  }
  func.func @transform_4(%arg0: i32) -> (i32, i32) {
    %c0_i32 = arith.constant 0 : i32
    %c0_i32_0 = arith.constant 0 : i32
    %c0_i32_1 = arith.constant 0 : i32
    return %c0_i32, %c0_i32_0 : i32, i32
  }
  func.func @transform_5(%arg0: i32) -> (i32, i32) {
    %c0_i32 = arith.constant 0 : i32
    %c0_i32_0 = arith.constant 0 : i32
    %c0_i32_1 = arith.constant 0 : i32
    return %c0_i32, %c0_i32_0 : i32, i32
  }
  func.func @transform_6(%arg0: i32) -> (i32, i32) {
    %c0_i32 = arith.constant 0 : i32
    %c0_i32_0 = arith.constant 0 : i32
    %c0_i32_1 = arith.constant 0 : i32
    return %c0_i32, %c0_i32_0 : i32, i32
  }
  func.func @transform_7(%arg0: i32) -> (i32, i32) {
    %c0_i32 = arith.constant 0 : i32
    %c0_i32_0 = arith.constant 0 : i32
    %c0_i32_1 = arith.constant 0 : i32
    return %c0_i32, %c0_i32_0 : i32, i32
  }
  func.func @transform_8(%arg0: i32) -> (i32, i32) {
    %c0_i32 = arith.constant 0 : i32
    %c0_i32_0 = arith.constant 0 : i32
    %c0_i32_1 = arith.constant 0 : i32
    return %c0_i32, %c0_i32_0 : i32, i32
  }
  func.func @transform_9(%arg0: i32) -> (i32, i32) {
    %c0_i32 = arith.constant 0 : i32
    %c0_i32_0 = arith.constant 0 : i32
    return %arg0, %c0_i32 : i32, i32
  }
}

</mosaic_0001>

<bundles_post_ra>
// kernel: tpu_custom_call.1
= control target key start
LH: loop header
LB: loop body
LE: loop exit
PB: predicated region body
PF: predicated region fallthrough
CT: control target
= control target key end

     0   :  { %14 = vsyncpa [#allocation3], 0  ;;  %s2266_s0 = inlined_call_operand.vmem [shape: f32[256,32], index: 0, kind: input, shape index: {}]   ;;  %s2267_s1 = inlined_call_operand.vmem [shape: bf16[32,256], index: 1, kind: input, shape index: {}]   ;;  %s2268_s2 = inlined_call_operand.vmem [shape: f32[1,256], index: 2, kind: input, shape index: {}]   ;;  %s2269_s3 = inlined_call_operand.vmem [shape: bf16[256,256], index: 3, kind: input, shape index: {}]   ;;  %s2270_s4 = inlined_call_operand.vmem [shape: f32[1,256], index: 4, kind: input, shape index: {}]   ;;  %s2271_s5 = inlined_call_operand.hbm [shape: bf16[256,128], index: 5, kind: input, shape index: {}]   ;;  %s2272_s6 = inlined_call_operand.vmem [shape: f32[1,128], index: 6, kind: input, shape index: {}]   ;;  %s2273_s7 = inlined_call_operand.vmem [shape: f32[1,128], index: 7, kind: input, shape index: {}]   ;;  %s2274_s8 = inlined_call_operand.vmem [shape: f32[1,128], index: 8, kind: input, shape index: {}]   ;;  %s2275_s9 = inlined_call_operand.hbm [shape: f32[256,128], index: 9, kind: output, shape index: {}]  }
   0x1   :  { %15 = vsyncpa [#allocation4], 0 }
   0x2   :  { %17 = vsyncpa [#allocation4 + $0x1], 0  ;;  %s1811_s30 = smov 0   ;;  %s1813_s10 = smov 0  }
   0x3   :  { %s1815_s11 = smov 0   ;;  %s1817_s12 = smov 0  }
   0x4 LB: > { %s1832_s13 = sadd.s32 4294967295, %s1752_s12   ;;  %s1359_s14 = sadd.s32 4294967294, %s1752_s12   ;;  %s1752_s12 = sphi %s1817_s12, %s2291_s12   ;;  %s1748_s11 = sphi %s1815_s11, %s2290_s11   ;;  %s1744_s10 = sphi %s1813_s10, %s2289_s10   ;;  %s1740_s30 = sphi %s1811_s30, %s2288_s30  }
   0x5   : > { %s1836_s15 = sadd.s32 1, %s1752_s12   ;;  %s224_s16 = sadd.s32 1, %s1748_s11 }
   0x6   : > { %s221_s17 = ssub.s32 %s1752_s12, %s1836_s15  ;;  %p234_p0 = scmp.ne.s32.totalorder %s1748_s11, %s1744_s10 }
   0x7   : > { %p222_p1 = scmp.eq.s32.totalorder %s221_s17, 0  ;;  %p235_p2 = scmp.eq.s32.totalorder %s1832_s13, 1 }
   0x8   : > { %p240_p3 = scmp.ne.s32.totalorder %s1744_s10, %s1740_s30  ;;  %p241_p4 = scmp.eq.s32.totalorder %s1359_s14, 1 }
   0x9   : > { %s1847_s18 = scalar_select %p222_p1, %s1748_s11, %s224_s16  }
   0xa   : > { %p1849_p5 = por %p235_p2, %p234_p0  ;;  %p1853_p6 = por %p241_p4, %p240_p3 }
   0xb   : > { %p1360_p7 = scmp.ge.s32.totalorder %s1752_s12, 1  ;;  %p248_p8 = scmp.lt.s32.totalorder %s1752_s12, 3 }
   0xc   : > { %s2279_s19 = scalar_select %p1849_p5, 1, 0 }
   0xd   : > { %s2280_s20 = scalar_select %p1853_p6, 1, 0 }
   0xe   : > { %p2276_p9 = scmp.eq.s32.totalorder %s1832_s13, 0  ;;  %p1860_p10 = pnand %p1360_p7, %p248_p8 }
   0xf   : > { %s1754_s22 = smov [#allocation2]   ;;  %s1658_s27 = scalar_lea.hbm %s2271_s5, 2048 }
  0x10   : > { %s2281_s21 = scalar_select %p1860_p10, 1, 0 }
  0x11   : > { %s272_s23 = sshll.u32 %s1754_s22, 4  ;;  %p1507_p11 = pneg %p1860_p10  ;;  %s273_s23 = int_to_ptr.vmem [resolvable:$true] %s272_s23 }
  0x12   : > { %p1659_p13 = scmp.ne.s32.totalorder %s2271_s5, %s1658_s27  ;;  %p1665_p3 = scmp.lt.u32.totalorder %s1658_s27, %s2271_s5 }
  0x13   : > { %p1868_p12 = pnand %p2276_p9, %p1507_p11 }
  0x15   : > { %p1660_p0 = pneg %p1868_p12 }
  0x17   : > { %p1661_p1 = pnand %p1660_p0, %p1659_p13 }
  0x19   : > { %p1662_p2 = pneg %p1661_p1 }
  0x1b   : > { %p1667_p4 = pnand %p1665_p3, %p1662_p2 }
  0x1d   : > { %1670 = shalt.err (!%p1667_p4)
}
  0x1e   : > { %s1671_s17 = scalar_lea.vmem %s273_s23, 2048  ;;  %p1679_p9 = scmp.lt.s32.totalorder %s273_s23, %s273_s23 }
  0x1f   : > { %p1672_p7 = scmp.ne.s32.totalorder %s273_s23, %s1671_s17  ;;  %p1680_p6 = scmp.lt.s32.totalorder %s1671_s17, %s1671_s17 }
  0x21   : > { %p1674_p8 = pnand %p1672_p7, %p1660_p0  ;;  %p1681_p5 = por %p1680_p6, %p1679_p9 }
  0x23   : > { %p1675_p11 = pneg %p1674_p8 }
  0x25   : > { %p1682_p10 = pnand %p1681_p5, %p1675_p11 }
  0x27   : > { %1685 = shalt.err (!%p1682_p10)
}
  0x28   : > { %s1755_s22 = smov 64   ;;  %s1756_s25 = smov 4  }
  0x29   : > { %1510 = dma.hbm_to_vmem [thread:$0]  (!%p1868_p12), %s2271_s5, 2048, %s273_s23, [#allocation3], %s1755_s22, %s1755_s22, %s1756_s25  }
  0x2a   : > { %p2283_p13 = scmp.ne.s32.totalorder %s2281_s21, 0 }
  0x2b   : > { %p2284_p1 = scmp.eq.s32.totalorder (!%p2283_p13), %s1832_s13, 0 }
  0x2c   : > { %306 = sbr.rel (%p2283_p13) target bundleno = 810 (0x32a), region = 56 }
  0x33   : > { %1731 = dma.done.wait (%p2284_p1), [#allocation3], 2048   ;;  %p2285_p0 = pmov %p2284_p1 }
  0x34   : > { %s1366_s27 = sshll.u32 %s1832_s13, 4  ;;  %v1757_v0 = vmov 0   ;;  %v1556_v1 = vld [vmem:[%s2267_s1 + $0x4] ss:$8 sps:$4 sm:$0xff]   ;;  %v1558_v2 = vld [vmem:[%s2267_s1] ss:$8 sps:$4 sm:$0xff]  }
  0x35   : > { %1733 = vsyncadd (%p2285_p0), [#allocation3], 4294965248  ;;  %467 = vmatprep.mubr.bf16.mxu0 %v1757_v0  ;;  %p343_p5 = scmp.lt.s32.totalorder %s1366_s27, 31  ;;  %435 = vmatprep.subr.bf16.mxu0 %v1556_v1  ;;  %v1559_v3 = vld [vmem:[%s2267_s1 + $0x14] ss:$8 sps:$4 sm:$0xff]   ;;  %vm410_vm0 = vcmask 261120  }
  0x36   : > { %436 = vmatpush1.bf16.msra.mxu0 %v1558_v2  ;;  %v1561_v4 = vld [vmem:[%s2267_s1 + $0x10] ss:$8 sps:$4 sm:$0xff]   ;;  %v1562_v8 = vld [vmem:[%s2269_s3 + $0x4] ss:$8 sps:$4 sm:$0xff]   ;;  %v1564_v9 = vld [vmem:[%s2269_s3] ss:$8 sps:$4 sm:$0xff]  }
  0x37   : > { %s2293_s27 = smov (!%p343_p5, %s1366_s27), 31  ;;  %437 = vmatprep.subr.bf16.mxu0 %v1559_v3  ;;  %800 = vmatprep.subr.bf16.mxu1 %v1562_v8  ;;  %v1565_v11 = vld [vmem:[%s2269_s3 + $0x14] ss:$8 sps:$4 sm:$0xff]   ;;  %v1567_v13 = vld [vmem:[%s2269_s3 + $0x10] ss:$8 sps:$4 sm:$0xff]   ;;  %v1610_v61 = vld [vmem:[#allocation2 + $0x40] sm:$0xff]  }
  0x38   : > { %s1367_s24 = sshll.u32 %s2293_s27, 3  ;;  %801 = vmatpush1.bf16.msra.mxu1 %v1564_v9  ;;  %v1568_v14 = vld [vmem:[%s2269_s3 + $0x24] ss:$8 sps:$4 sm:$0xff]   ;;  %v1570_v16 = vld [vmem:[%s2269_s3 + $0x20] ss:$8 sps:$4 sm:$0xff]   ;;  %v1614_v1 = vld [vmem:[#allocation2 + $0x50] sm:$0xff]  }
  0x39   : > { %s1902_s16 = scalar_lea.vmem %s2266_s0, %s1367_s24  ;;  %802 = vmatprep.subr.bf16.mxu1 %v1565_v11  ;;  %v1571_v17 = vld [vmem:[%s2269_s3 + $0x34] ss:$8 sps:$4 sm:$0xff]   ;;  %v1573_v20 = vld [vmem:[%s2269_s3 + $0x30] ss:$8 sps:$4 sm:$0xff]   ;;  %v1574_v21 = vld [vmem:[%s2269_s3 + $0x44] ss:$8 sps:$4 sm:$0xff]   ;;  %v380_v11 = vlaneseq }
  0x3a   : > { %v350_v5 = vld [vmem:[%s1902_s16] sm:$0xff]  ;;  %v351_v6 = vld [vmem:[%s1902_s16 + $0x8] sm:$0xff]  ;;  %438 = vmatpush1.bf16.msra.mxu0 %v1561_v4  ;;  %v352_v10 = vld [vmem:[%s1902_s16 + $0x10] sm:$0xff]  ;;  %s339_s21 = sand.u32 1, %s1744_s10   ;;  %s1436_s28 = sshll.u32 %s1832_s13, 11 }
  0x3b   : > { %v366_v7 = vpack.c.bf16 %v351_v6, %v350_v5  ;;  %v353_v12 = vld [vmem:[%s1902_s16 + $0x18] sm:$0xff]  ;;  %v354_v18 = vld [vmem:[%s1902_s16 + $0x20] sm:$0xff]  ;;  %v355_v19 = vld [vmem:[%s1902_s16 + $0x28] sm:$0xff]  ;;  %1437 = vmatprep.subr.bf16.mxu0 %v1610_v61  ;;  %s1365_s17 = sshll.u32 %s339_s21, 7  ;;  %s2216_s14 = scalar_lea.hbm %s2275_s9, %s1436_s28 }
  0x3c   : > { %v367_v15 = vpack.c.bf16 %v353_v12, %v352_v10  ;;  %803 = vmatpush1.bf16.msra.mxu1 %v1567_v13  ;;  %v368_v22 = vpack.c.bf16 %v355_v19, %v354_v18  ;;  %v1576_v23 = vld [vmem:[%s2269_s3 + $0x40] ss:$8 sps:$4 sm:$0xff]   ;;  %v1577_v24 = vld [vmem:[%s2269_s3 + $0x54] ss:$8 sps:$4 sm:$0xff]   ;;  %v1579_v27 = vld [vmem:[%s2269_s3 + $0x50] ss:$8 sps:$4 sm:$0xff]  }
  0x3d   : > { %1372 = vmatmul.mubr.msk.bf16.vlgmr.msra.gmra.mrb[0].mxu0 %vm410_vm0, %v366_v7  ;;  %804 = vmatprep.subr.bf16.mxu1 %v1568_v14  ;;  %v356_v25 = vld [vmem:[%s1902_s16 + $0x30] sm:$0xff]  ;;  %v357_v26 = vld [vmem:[%s1902_s16 + $0x38] sm:$0xff]  ;;  %v1580_v28 = vld [vmem:[%s2269_s3 + $0x64] ss:$8 sps:$4 sm:$0xff]   ;;  %v2040_v12 = vshrl.u32 %v380_v11, 7  ;;  %s2156_s26 = scalar_lea.vmem [#allocation5], %s1365_s17 }
  0x3e   : > { %477 = vmatprep.mubr.bf16.mxu0 %v1757_v0  ;;  %v1582_v29 = vld [vmem:[%s2269_s3 + $0x60] ss:$8 sps:$4 sm:$0xff]   ;;  %v369_v30 = vpack.c.bf16 %v357_v26, %v356_v25  ;;  %v1583_v31 = vld [vmem:[%s2269_s3 + $0x74] ss:$8 sps:$4 sm:$0xff]   ;;  %v1585_v34 = vld [vmem:[%s2269_s3 + $0x70] ss:$8 sps:$4 sm:$0xff]  }
  0x3f   : > { %v358_v32 = vld [vmem:[%s1902_s16 + $0x40] sm:$0xff]  ;;  %v359_v33 = vld [vmem:[%s1902_s16 + $0x48] sm:$0xff]  ;;  %v1589_v38 = vld [vmem:[%s2269_s3 + $0x94] ss:$8 sps:$4 sm:$0xff]   ;;  %v382_v13 = vsub.s32 0, %v2040_v12  ;;  %s1285_s27 = sshll.u32 %s2156_s26, 4  ;;  %s2218_s27 = int_to_ptr.vmem [resolvable:$true] %s1285_s27 }
  0x40   : > { %805 = vmatpush1.bf16.msra.mxu1 %v1570_v16  ;;  %v1586_v35 = vld [vmem:[%s2269_s3 + $0x84] ss:$8 sps:$4 sm:$0xff]   ;;  %v370_v36 = vpack.c.bf16 %v359_v33, %v358_v32  ;;  %v1588_v37 = vld [vmem:[%s2269_s3 + $0x80] ss:$8 sps:$4 sm:$0xff]   ;;  %v360_v39 = vld [vmem:[%s1902_s16 + $0x50] sm:$0xff]  ;;  %s2225_s13 = scalar_lea.sflag [#allocation4], %s339_s21 }
  0x41   : > { %806 = vmatprep.subr.bf16.mxu1 %v1571_v17  ;;  %v361_v40 = vld [vmem:[%s1902_s16 + $0x58] sm:$0xff]  ;;  %v1592_v42 = vld [vmem:[%s2269_s3 + $0xa4] ss:$8 sps:$4 sm:$0xff]   ;;  %v1594_v44 = vld [vmem:[%s2269_s3 + $0xa0] ss:$8 sps:$4 sm:$0xff]   ;;  %s1686_s23 = scalar_lea.vmem %s2218_s27, 2048 }
  0x42   : > { %v1591_v41 = vld [vmem:[%s2269_s3 + $0x90] ss:$8 sps:$4 sm:$0xff]   ;;  %v371_v43 = vpack.c.bf16 %v361_v40, %v360_v39  ;;  %v1595_v45 = vld [vmem:[%s2269_s3 + $0xb4] ss:$8 sps:$4 sm:$0xff]   ;;  %v362_v46 = vld [vmem:[%s1902_s16 + $0x60] sm:$0xff]  ;;  %p1687_p6 = scmp.ne.s32.totalorder %s2218_s27, %s1686_s23  ;;  %p2286_p9 = scmp.ne.s32.totalorder %s2279_s19, 0 }
  0x43   : > { %v363_v47 = vld [vmem:[%s1902_s16 + $0x68] sm:$0xff]  ;;  %v1597_v48 = vld [vmem:[%s2269_s3 + $0xb0] ss:$8 sps:$4 sm:$0xff]   ;;  %v1601_v52 = vld [vmem:[%s2269_s3 + $0xd4] ss:$8 sps:$4 sm:$0xff]  }
  0x44   : > { %807 = vmatpush1.bf16.msra.mxu1 %v1573_v20  ;;  %v1598_v49 = vld [vmem:[%s2269_s3 + $0xc4] ss:$8 sps:$4 sm:$0xff]   ;;  %v372_v50 = vpack.c.bf16 %v363_v47, %v362_v46  ;;  %v1600_v51 = vld [vmem:[%s2269_s3 + $0xc0] ss:$8 sps:$4 sm:$0xff]   ;;  %v364_v53 = vld [vmem:[%s1902_s16 + $0x70] sm:$0xff]  ;;  %p1688_p10 = pnand %p1687_p6, %p2286_p9 }
  0x45   : > { %1373 = vmatmul.mubr.msk.bf16.gmra.mrb[4].mxu0 %vm410_vm0, %v367_v15  ;;  %808 = vmatprep.subr.bf16.mxu1 %v1574_v21  ;;  %v365_v54 = vld [vmem:[%s1902_s16 + $0x78] sm:$0xff]  ;;  %v1604_v57 = vld [vmem:[%s2269_s3 + $0xe4] ss:$8 sps:$4 sm:$0xff]   ;;  %v1606_v58 = vld [vmem:[%s2269_s3 + $0xe0] ss:$8 sps:$4 sm:$0xff]   ;;  %v386_v15 = vsub.s32 1, %v2040_v12 }
  0x46   : > { %487 = vmatprep.mubr.bf16.mxu0 %v1757_v0  ;;  %v373_v55 = vpack.c.bf16 %v365_v54, %v364_v53  ;;  %v1603_v56 = vld [vmem:[%s2269_s3 + $0xd0] ss:$8 sps:$4 sm:$0xff]   ;;  %v1607_v59 = vld [vmem:[%s2269_s3 + $0xf4] ss:$8 sps:$4 sm:$0xff]   ;;  %v1611_v62 = vld [vmem:[#allocation2] sm:$0xff]   ;;  %p1689_p12 = pneg %p1688_p10  ;;  %s1758_s16 = smov [#allocation5]  }
  0x47   : > { %v1609_v60 = vld [vmem:[%s2269_s3 + $0xf0] ss:$8 sps:$4 sm:$0xff]   ;;  %v1612_v63 = vld [vmem:[#allocation2 + $0x48] sm:$0xff]   ;;  %1438 = vmatpush3.bf16.msra.mxu0 %v1611_v62  ;;  %v1618_v5 = vld [vmem:[#allocation2 + $0x60] sm:$0xff]   ;;  %s1690_s17 = sshll.u32 %s1758_s16, 4  ;;  %s1691_s17 = int_to_ptr.vmem [resolvable:$false] %s1690_s17 }
  0x48   : > { %809 = vmatpush1.bf16.msra.mxu1 %v1576_v23  ;;  %1439 = vmatprep.subr.bf16.mxu0 %v1612_v63  ;;  %v1615_v2 = vld [vmem:[#allocation2 + $0x10] sm:$0xff]   ;;  %v1616_v3 = vld [vmem:[#allocation2 + $0x58] sm:$0xff]   ;;  %v1619_v6 = vld [vmem:[#allocation2 + $0x20] sm:$0xff]   ;;  %s1692_s22 = scalar_lea.vmem %s1691_s17, 4096  ;;  %p1693_p2 = scmp.lt.s32.totalorder %s2218_s27, %s1691_s17 }
  0x49   : > { %810 = vmatprep.subr.bf16.mxu1 %v1577_v24  ;;  %v1617_v4 = vld [vmem:[#allocation2 + $0x18] sm:$0xff]   ;;  %v1620_v7 = vld [vmem:[#allocation2 + $0x68] sm:$0xff]   ;;  %v1622_v9 = vld [vmem:[#allocation2 + $0x70] sm:$0xff]   ;;  %p1694_p3 = scmp.lt.s32.totalorder %s1692_s22, %s1686_s23 }
  0x4a   : > { %v1621_v8 = vld [vmem:[#allocation2 + $0x28] sm:$0xff]   ;;  %v1623_v10 = vld [vmem:[#allocation2 + $0x30] sm:$0xff]   ;;  %v378_v14 = vld [vmem:[%s2268_s2] sm:$0x3] }
  0x4b   : > { %v2049_v16 = vrot.slane %v378_v14, %v382_v13  ;;  %v2053_v17 = vrot.slane %v378_v14, %v386_v15  ;;  %p1695_p4 = por %p1694_p3, %p1693_p2 }
  0x4c   : > { %811 = vmatpush1.bf16.msra.mxu1 %v1579_v27 }
  0x4d   : > { %1374 = vmatmul.mubr.msk.bf16.gmra.mrb[8].mxu0 %vm410_vm0, %v368_v22  ;;  %812 = vmatprep.subr.bf16.mxu1 %v1580_v28  ;;  %p1696_p7 = pnand %p1695_p4, %p1689_p12 }
  0x4e   : > { %497 = vmatprep.mubr.bf16.mxu0 %v1757_v0 }
  0x50   : > { %813 = vmatpush1.bf16.msra.mxu1 %v1582_v29 }
  0x51   : > { %814 = vmatprep.subr.bf16.mxu1 %v1583_v31 }
  0x54   : > { %815 = vmatpush1.bf16.msra.mxu1 %v1585_v34 }
  0x55   : > { %1375 = vmatmul.mubr.msk.bf16.gmra.mrb[12].mxu0 %vm410_vm0, %v369_v30  ;;  %816 = vmatprep.subr.bf16.mxu1 %v1586_v35 }
  0x56   : > { %507 = vmatprep.mubr.bf16.mxu0 %v1757_v0 }
  0x58   : > { %817 = vmatpush1.bf16.msra.mxu1 %v1588_v37 }
  0x59   : > { %818 = vmatprep.subr.bf16.mxu1 %v1589_v38 }
  0x5c   : > { %819 = vmatpush1.bf16.msra.mxu1 %v1591_v41 }
  0x5d   : > { %1376 = vmatmul.mubr.msk.bf16.gmra.mrb[16].mxu0 %vm410_vm0, %v370_v36  ;;  %820 = vmatprep.subr.bf16.mxu1 %v1592_v42 }
  0x5e   : > { %517 = vmatprep.mubr.bf16.mxu0 %v1757_v0 }
  0x60   : > { %821 = vmatpush1.bf16.msra.mxu1 %v1594_v44 }
  0x61   : > { %822 = vmatprep.subr.bf16.mxu1 %v1595_v45 }
  0x64   : > { %823 = vmatpush1.bf16.msra.mxu1 %v1597_v48 }
  0x65   : > { %1377 = vmatmul.mubr.msk.bf16.gmra.mrb[20].mxu0 %vm410_vm0, %v371_v43  ;;  %824 = vmatprep.subr.bf16.mxu1 %v1598_v49 }
  0x66   : > { %527 = vmatprep.mubr.bf16.mxu0 %v1757_v0 }
  0x68   : > { %825 = vmatpush1.bf16.msra.mxu1 %v1600_v51 }
  0x69   : > { %826 = vmatprep.subr.bf16.mxu1 %v1601_v52 }
  0x6c   : > { %827 = vmatpush1.bf16.msra.mxu1 %v1603_v56 }
  0x6d   : > { %1378 = vmatmul.mubr.msk.bf16.gmra.mrb[24].mxu0 %vm410_vm0, %v372_v50  ;;  %828 = vmatprep.subr.bf16.mxu1 %v1604_v57 }
  0x6e   : > { %537 = vmatprep.mubr.bf16.mxu0 %v1757_v0  ;;  %v1613_v0 = vld [vmem:[#allocation2 + $0x8] sm:$0xff]  }
  0x6f   : > { %1440 = vmatpush3.bf16.msra.mxu0 %v1613_v0 }
  0x70   : > { %829 = vmatpush1.bf16.msra.mxu1 %v1606_v58  ;;  %1441 = vmatprep.subr.bf16.mxu0 %v1614_v1 }
  0x71   : > { %830 = vmatprep.subr.bf16.mxu1 %v1607_v59 }
  0x73   : > { %1442 = vmatpush3.bf16.msra.mxu0 %v1615_v2 }
  0x74   : > { %831 = vmatpush1.bf16.msra.mxu1 %v1609_v60  ;;  %1443 = vmatprep.subr.bf16.mxu0 %v1616_v3 }
  0x75   : > { %1379 = vmatmul.mubr.msk.bf16.gmra.mrb[28].mxu0 %vm410_vm0, %v373_v55 }
  0x77   : > { %1444 = vmatpush3.bf16.msra.mxu0 %v1617_v4 }
  0x78   : > { %1445 = vmatprep.subr.bf16.mxu0 %v1618_v5 }
  0x7b   : > { %1446 = vmatpush3.bf16.msra.mxu0 %v1619_v6 }
  0x7c   : > { %1447 = vmatprep.subr.bf16.mxu0 %v1620_v7 }
  0x7f   : > { %1448 = vmatpush3.bf16.msra.mxu0 %v1621_v8 }
  0x80   : > { %1449 = vmatprep.subr.bf16.mxu0 %v1622_v9 }
  0x83   : > { %1450 = vmatpush3.bf16.msra.mxu0 %v1623_v10 }
 0x110   : > { %v469_v18 = vpop.f32.mrb[0].mxu0 }
 0x111   : > { %v470_v19 = vadd.f32 %v469_v18, %v2049_v16  ;;  %v471_v20 = vpop.f32.mrb[1].mxu0 }
 0x112   : > { %v472_v21 = vadd.f32 %v471_v20, %v2053_v17  ;;  %v473_v22 = vpop.f32.mrb[2].mxu0 }
 0x113   : > { %v474_v23 = vadd.f32 %v473_v22, %v2049_v16  ;;  %v475_v24 = vpop.f32.mrb[3].mxu0  ;;  %v548_v26 = vmax.f32 %v470_v19, 0.0 }
 0x114   : > { %v476_v25 = vadd.f32 %v475_v24, %v2053_v17  ;;  %v549_v28 = vmax.f32 %v472_v21, 0.0 }
 0x115   : > { %v550_v27 = vmax.f32 %v474_v23, 0.0 }
 0x116   : > { %v551_v29 = vmax.f32 %v476_v25, 0.0 }
 0x117   : > { %v580_v30 = vpack.c.bf16 %v550_v27, %v548_v26 }
 0x118   : > { %v479_v31 = vpop.f32.mrb[4].mxu0  ;;  %v581_v32 = vpack.c.bf16 %v551_v29, %v549_v28 }
 0x119   : > { %v480_v33 = vadd.f32 %v479_v31, %v2049_v16  ;;  %v481_v34 = vpop.f32.mrb[5].mxu0 }
 0x11a   : > { %v482_v35 = vadd.f32 %v481_v34, %v2053_v17  ;;  %v483_v36 = vpop.f32.mrb[6].mxu0  ;;  %832 = vmatprep.mubr.bf16.mxu1 %v581_v32 }
 0x11b   : > { %v484_v37 = vadd.f32 %v483_v36, %v2049_v16  ;;  %v485_v38 = vpop.f32.mrb[7].mxu0  ;;  %833 = vmatmul.mubr.bf16.vlgmr.msra.gmra.mrb[0].mxu1 %v580_v30  ;;  %v552_v40 = vmax.f32 %v480_v33, 0.0 }
 0x11c   : > { %v486_v39 = vadd.f32 %v485_v38, %v2053_v17  ;;  %v553_v42 = vmax.f32 %v482_v35, 0.0 }
 0x11d   : > { %v554_v41 = vmax.f32 %v484_v37, 0.0 }
 0x11e   : > { %v555_v43 = vmax.f32 %v486_v39, 0.0 }
 0x11f   : > { %v582_v44 = vpack.c.bf16 %v554_v41, %v552_v40 }
 0x120   : > { %v583_v45 = vpack.c.bf16 %v555_v43, %v553_v42  ;;  %v489_v46 = vpop.f32.mrb[8].mxu0 }
 0x121   : > { %v490_v47 = vadd.f32 %v489_v46, %v2049_v16  ;;  %v491_v48 = vpop.f32.mrb[9].mxu0 }
 0x122   : > { %v492_v49 = vadd.f32 %v491_v48, %v2053_v17  ;;  %v493_v50 = vpop.f32.mrb[10].mxu0  ;;  %842 = vmatprep.mubr.bf16.mxu1 %v583_v45 }
 0x123   : > { %v494_v51 = vadd.f32 %v493_v50, %v2049_v16  ;;  %v495_v52 = vpop.f32.mrb[11].mxu0  ;;  %843 = vmatmul.mubr.bf16.gmra.mrb[4].mxu1 %v582_v44  ;;  %v556_v54 = vmax.f32 %v490_v47, 0.0 }
 0x124   : > { %v496_v53 = vadd.f32 %v495_v52, %v2053_v17  ;;  %v557_v56 = vmax.f32 %v492_v49, 0.0 }
 0x125   : > { %v558_v55 = vmax.f32 %v494_v51, 0.0 }
 0x126   : > { %v559_v57 = vmax.f32 %v496_v53, 0.0 }
 0x127   : > { %v584_v58 = vpack.c.bf16 %v558_v55, %v556_v54 }
 0x128   : > { %v585_v59 = vpack.c.bf16 %v559_v57, %v557_v56  ;;  %v499_v60 = vpop.f32.mrb[12].mxu0 }
 0x129   : > { %v500_v61 = vadd.f32 %v499_v60, %v2049_v16  ;;  %v501_v62 = vpop.f32.mrb[13].mxu0 }
 0x12a   : > { %v502_v63 = vadd.f32 %v501_v62, %v2053_v17  ;;  %v503_v0 = vpop.f32.mrb[14].mxu0  ;;  %852 = vmatprep.mubr.bf16.mxu1 %v585_v59 }
 0x12b   : > { %v504_v1 = vadd.f32 %v503_v0, %v2049_v16  ;;  %v505_v2 = vpop.f32.mrb[15].mxu0  ;;  %853 = vmatmul.mubr.bf16.gmra.mrb[8].mxu1 %v584_v58  ;;  %v560_v4 = vmax.f32 %v500_v61, 0.0 }
 0x12c   : > { %v506_v3 = vadd.f32 %v505_v2, %v2053_v17  ;;  %v561_v6 = vmax.f32 %v502_v63, 0.0 }
 0x12d   : > { %v562_v5 = vmax.f32 %v504_v1, 0.0 }
 0x12e   : > { %v563_v7 = vmax.f32 %v506_v3, 0.0 }
 0x12f   : > { %v586_v8 = vpack.c.bf16 %v562_v5, %v560_v4 }
 0x130   : > { %v587_v9 = vpack.c.bf16 %v563_v7, %v561_v6  ;;  %v509_v10 = vpop.f32.mrb[16].mxu0  ;;  %v1624_v7 = vld [vmem:[#allocation2 + $0x78] sm:$0xff]  }
 0x131   : > { %v510_v11 = vadd.f32 %v509_v10, %v2049_v16  ;;  %v511_v14 = vpop.f32.mrb[17].mxu0  ;;  %1451 = vmatprep.subr.bf16.mxu0 %v1624_v7 }
 0x132   : > { %v512_v18 = vadd.f32 %v511_v14, %v2053_v17  ;;  %v513_v19 = vpop.f32.mrb[18].mxu0  ;;  %862 = vmatprep.mubr.bf16.mxu1 %v587_v9 }
 0x133   : > { %v514_v20 = vadd.f32 %v513_v19, %v2049_v16  ;;  %v515_v21 = vpop.f32.mrb[19].mxu0  ;;  %863 = vmatmul.mubr.bf16.gmra.mrb[12].mxu1 %v586_v8  ;;  %v564_v23 = vmax.f32 %v510_v11, 0.0  ;;  %v1625_v8 = vld [vmem:[#allocation2 + $0x38] sm:$0xff]  }
 0x134   : > { %v516_v22 = vadd.f32 %v515_v21, %v2053_v17  ;;  %v565_v25 = vmax.f32 %v512_v18, 0.0  ;;  %1452 = vmatpush3.bf16.msra.mxu0 %v1625_v8 }
 0x135   : > { %v566_v24 = vmax.f32 %v514_v20, 0.0 }
 0x136   : > { %v567_v26 = vmax.f32 %v516_v22, 0.0 }
 0x137   : > { %v588_v27 = vpack.c.bf16 %v566_v24, %v564_v23 }
 0x138   : > { %v589_v28 = vpack.c.bf16 %v567_v26, %v565_v25  ;;  %v519_v29 = vpop.f32.mrb[20].mxu0 }
 0x139   : > { %v520_v30 = vadd.f32 %v519_v29, %v2049_v16  ;;  %v521_v31 = vpop.f32.mrb[21].mxu0 }
 0x13a   : > { %v522_v32 = vadd.f32 %v521_v31, %v2053_v17  ;;  %v523_v33 = vpop.f32.mrb[22].mxu0  ;;  %872 = vmatprep.mubr.bf16.mxu1 %v589_v28 }
 0x13b   : > { %v524_v34 = vadd.f32 %v523_v33, %v2049_v16  ;;  %v525_v35 = vpop.f32.mrb[23].mxu0  ;;  %873 = vmatmul.mubr.bf16.gmra.mrb[16].mxu1 %v588_v27  ;;  %v568_v37 = vmax.f32 %v520_v30, 0.0 }
 0x13c   : > { %v526_v36 = vadd.f32 %v525_v35, %v2053_v17  ;;  %v569_v39 = vmax.f32 %v522_v32, 0.0 }
 0x13d   : > { %v570_v38 = vmax.f32 %v524_v34, 0.0 }
 0x13e   : > { %v571_v40 = vmax.f32 %v526_v36, 0.0 }
 0x13f   : > { %v590_v41 = vpack.c.bf16 %v570_v38, %v568_v37 }
 0x140   : > { %v591_v42 = vpack.c.bf16 %v571_v40, %v569_v39  ;;  %v529_v43 = vpop.f32.mrb[24].mxu0 }
 0x141   : > { %v530_v44 = vadd.f32 %v529_v43, %v2049_v16  ;;  %v531_v45 = vpop.f32.mrb[25].mxu0 }
 0x142   : > { %v532_v46 = vadd.f32 %v531_v45, %v2053_v17  ;;  %v533_v47 = vpop.f32.mrb[26].mxu0  ;;  %882 = vmatprep.mubr.bf16.mxu1 %v591_v42 }
 0x143   : > { %v534_v48 = vadd.f32 %v533_v47, %v2049_v16  ;;  %v535_v49 = vpop.f32.mrb[27].mxu0  ;;  %883 = vmatmul.mubr.bf16.gmra.mrb[20].mxu1 %v590_v41  ;;  %v572_v51 = vmax.f32 %v530_v44, 0.0 }
 0x144   : > { %v536_v50 = vadd.f32 %v535_v49, %v2053_v17  ;;  %v573_v53 = vmax.f32 %v532_v46, 0.0 }
 0x145   : > { %v574_v52 = vmax.f32 %v534_v48, 0.0 }
 0x146   : > { %v575_v54 = vmax.f32 %v536_v50, 0.0 }
 0x147   : > { %v592_v55 = vpack.c.bf16 %v574_v52, %v572_v51 }
 0x148   : > { %v593_v56 = vpack.c.bf16 %v575_v54, %v573_v53  ;;  %v539_v57 = vpop.f32.mrb[28].mxu0 }
 0x149   : > { %v540_v58 = vadd.f32 %v539_v57, %v2049_v16  ;;  %v541_v59 = vpop.f32.mrb[29].mxu0 }
 0x14a   : > { %v542_v60 = vadd.f32 %v541_v59, %v2053_v17  ;;  %v543_v61 = vpop.f32.mrb[30].mxu0  ;;  %892 = vmatprep.mubr.bf16.mxu1 %v593_v56 }
 0x14b   : > { %v544_v62 = vadd.f32 %v543_v61, %v2049_v16  ;;  %v545_v63 = vpop.f32.mrb[31].mxu0  ;;  %893 = vmatmul.mubr.bf16.gmra.mrb[24].mxu1 %v592_v55  ;;  %v576_v1 = vmax.f32 %v540_v58, 0.0  ;;  %v628_v16 = vld [vmem:[%s2270_s4] sm:$0x3] }
 0x14c   : > { %v546_v0 = vadd.f32 %v545_v63, %v2053_v17  ;;  %v577_v3 = vmax.f32 %v542_v60, 0.0  ;;  %v2092_v9 = vrot.slane %v628_v16, %v382_v13  ;;  %v2096_v17 = vrot.slane %v628_v16, %v386_v15 }
 0x14d   : > { %v578_v2 = vmax.f32 %v544_v62, 0.0 }
 0x14e   : > { %v579_v4 = vmax.f32 %v546_v0, 0.0 }
 0x14f   : > { %v594_v5 = vpack.c.bf16 %v578_v2, %v576_v1 }
 0x150   : > { %v595_v6 = vpack.c.bf16 %v579_v4, %v577_v3 }
 0x152   : > { %902 = vmatprep.mubr.bf16.mxu1 %v595_v6 }
 0x153   : > { %903 = vmatmul.mubr.bf16.gmra.mrb[28].mxu1 %v594_v5 }
 0x1ee   : > { %v834_v10 = vpop.f32.mrb[0].mxu1 }
 0x1ef   : > { %v835_v11 = vadd.f32 %v834_v10, %v2092_v9  ;;  %v836_v14 = vpop.f32.mrb[1].mxu1 }
 0x1f0   : > { %v837_v18 = vadd.f32 %v836_v14, %v2096_v17  ;;  %v838_v19 = vpop.f32.mrb[2].mxu1 }
 0x1f1   : > { %v839_v20 = vadd.f32 %v838_v19, %v2092_v9  ;;  %v840_v21 = vpop.f32.mrb[3].mxu1  ;;  %v913_v23 = vmax.f32 %v835_v11, 0.0 }
 0x1f2   : > { %v841_v22 = vadd.f32 %v840_v21, %v2096_v17  ;;  %v914_v13 = vmax.f32 %v837_v18, 0.0 }
 0x1f3   : > { %v915_v24 = vmax.f32 %v839_v20, 0.0 }
 0x1f4   : > { %v916_v25 = vmax.f32 %v841_v22, 0.0 }
 0x1f5   : > { %v945_v26 = vpack.c.bf16 %v915_v24, %v913_v23 }
 0x1f6   : > { %v946_v12 = vpack.c.bf16 %v916_v25, %v914_v13  ;;  %v844_v15 = vpop.f32.mrb[4].mxu1 }
 0x1f7   : > { %v845_v27 = vadd.f32 %v844_v15, %v2092_v9  ;;  %v846_v28 = vpop.f32.mrb[5].mxu1 }
 0x1f8   : > { %v847_v29 = vadd.f32 %v846_v28, %v2096_v17  ;;  %v848_v30 = vpop.f32.mrb[6].mxu1  ;;  %1128 = vmatprep.mubr.bf16.mxu0 %v946_v12 }
 0x1f9   : > { %v849_v31 = vadd.f32 %v848_v30, %v2092_v9  ;;  %v850_v32 = vpop.f32.mrb[7].mxu1  ;;  %1129 = vmatmul.mubr.bf16.vlgmr.msra.gmra.mrb[32].mxu0 %v945_v26  ;;  %v917_v34 = vmax.f32 %v845_v27, 0.0 }
 0x1fa   : > { %v851_v33 = vadd.f32 %v850_v32, %v2096_v17  ;;  %v918_v36 = vmax.f32 %v847_v29, 0.0 }
 0x1fb   : > { %v919_v35 = vmax.f32 %v849_v31, 0.0 }
 0x1fc   : > { %v920_v37 = vmax.f32 %v851_v33, 0.0 }
 0x1fd   : > { %v947_v38 = vpack.c.bf16 %v919_v35, %v917_v34 }
 0x1fe   : > { %v948_v39 = vpack.c.bf16 %v920_v37, %v918_v36  ;;  %v854_v40 = vpop.f32.mrb[8].mxu1 }
 0x1ff   : > { %v855_v41 = vadd.f32 %v854_v40, %v2092_v9  ;;  %v856_v42 = vpop.f32.mrb[9].mxu1 }
 0x200   : > { %v857_v43 = vadd.f32 %v856_v42, %v2096_v17  ;;  %v858_v44 = vpop.f32.mrb[10].mxu1  ;;  %1136 = vmatprep.mubr.bf16.mxu0 %v948_v39 }
 0x201   : > { %v859_v45 = vadd.f32 %v858_v44, %v2092_v9  ;;  %v860_v46 = vpop.f32.mrb[11].mxu1  ;;  %1137 = vmatmul.mubr.bf16.gmra.mrb[36].mxu0 %v947_v38  ;;  %v921_v48 = vmax.f32 %v855_v41, 0.0 }
 0x202   : > { %v861_v47 = vadd.f32 %v860_v46, %v2096_v17  ;;  %v922_v50 = vmax.f32 %v857_v43, 0.0 }
 0x203   : > { %v923_v49 = vmax.f32 %v859_v45, 0.0 }
 0x204   : > { %v924_v51 = vmax.f32 %v861_v47, 0.0 }
 0x205   : > { %v949_v52 = vpack.c.bf16 %v923_v49, %v921_v48 }
 0x206   : > { %v950_v53 = vpack.c.bf16 %v924_v51, %v922_v50  ;;  %v864_v54 = vpop.f32.mrb[12].mxu1 }
 0x207   : > { %v865_v55 = vadd.f32 %v864_v54, %v2092_v9  ;;  %v866_v56 = vpop.f32.mrb[13].mxu1 }
 0x208   : > { %v867_v57 = vadd.f32 %v866_v56, %v2096_v17  ;;  %v868_v58 = vpop.f32.mrb[14].mxu1  ;;  %1144 = vmatprep.mubr.bf16.mxu0 %v950_v53 }
 0x209   : > { %v869_v59 = vadd.f32 %v868_v58, %v2092_v9  ;;  %v870_v60 = vpop.f32.mrb[15].mxu1  ;;  %1145 = vmatmul.mubr.bf16.gmra.mrb[40].mxu0 %v949_v52  ;;  %v925_v62 = vmax.f32 %v865_v55, 0.0 }
 0x20a   : > { %v871_v61 = vadd.f32 %v870_v60, %v2096_v17  ;;  %v926_v0 = vmax.f32 %v867_v57, 0.0 }
 0x20b   : > { %v927_v63 = vmax.f32 %v869_v59, 0.0 }
 0x20c   : > { %v928_v1 = vmax.f32 %v871_v61, 0.0 }
 0x20d   : > { %v951_v2 = vpack.c.bf16 %v927_v63, %v925_v62  ;;  %v2133_v63 = vld [vmem:[%s2272_s6] ss:$0 sm:$0xff] }
 0x20e   : > { %v952_v3 = vpack.c.bf16 %v928_v1, %v926_v0  ;;  %v874_v4 = vpop.f32.mrb[16].mxu1 }
 0x20f   : > { %v875_v5 = vadd.f32 %v874_v4, %v2092_v9  ;;  %v876_v6 = vpop.f32.mrb[17].mxu1 }
 0x210   : > { %v877_v7 = vadd.f32 %v876_v6, %v2096_v17  ;;  %v878_v8 = vpop.f32.mrb[18].mxu1  ;;  %1152 = vmatprep.mubr.bf16.mxu0 %v952_v3 }
 0x211   : > { %v879_v16 = vadd.f32 %v878_v8, %v2092_v9  ;;  %v880_v10 = vpop.f32.mrb[19].mxu1  ;;  %1153 = vmatmul.mubr.bf16.gmra.mrb[44].mxu0 %v951_v2  ;;  %v929_v14 = vmax.f32 %v875_v5, 0.0 }
 0x212   : > { %v881_v11 = vadd.f32 %v880_v10, %v2096_v17  ;;  %v930_v19 = vmax.f32 %v877_v7, 0.0 }
 0x213   : > { %v931_v18 = vmax.f32 %v879_v16, 0.0 }
 0x214   : > { %v932_v20 = vmax.f32 %v881_v11, 0.0 }
 0x215   : > { %v953_v21 = vpack.c.bf16 %v931_v18, %v929_v14  ;;  %v2142_v14 = vld [vmem:[%s2273_s7] ss:$0 sm:$0xff] }
 0x216   : > { %v954_v22 = vpack.c.bf16 %v932_v20, %v930_v19  ;;  %v884_v23 = vpop.f32.mrb[20].mxu1  ;;  %v2150_v20 = vld [vmem:[%s2274_s8] ss:$0 sm:$0xff] }
 0x217   : > { %v885_v24 = vadd.f32 %v884_v23, %v2092_v9  ;;  %v886_v13 = vpop.f32.mrb[21].mxu1 }
 0x218   : > { %v887_v25 = vadd.f32 %v886_v13, %v2096_v17  ;;  %v888_v26 = vpop.f32.mrb[22].mxu1  ;;  %1160 = vmatprep.mubr.bf16.mxu0 %v954_v22 }
 0x219   : > { %v889_v12 = vadd.f32 %v888_v26, %v2092_v9  ;;  %v890_v15 = vpop.f32.mrb[23].mxu1  ;;  %1161 = vmatmul.mubr.bf16.gmra.mrb[48].mxu0 %v953_v21  ;;  %v933_v28 = vmax.f32 %v885_v24, 0.0 }
 0x21a   : > { %v891_v27 = vadd.f32 %v890_v15, %v2096_v17  ;;  %v934_v30 = vmax.f32 %v887_v25, 0.0 }
 0x21b   : > { %v935_v29 = vmax.f32 %v889_v12, 0.0 }
 0x21c   : > { %v936_v31 = vmax.f32 %v891_v27, 0.0 }
 0x21d   : > { %v955_v32 = vpack.c.bf16 %v935_v29, %v933_v28 }
 0x21e   : > { %v956_v33 = vpack.c.bf16 %v936_v31, %v934_v30  ;;  %v894_v34 = vpop.f32.mrb[24].mxu1 }
 0x21f   : > { %v895_v35 = vadd.f32 %v894_v34, %v2092_v9  ;;  %v896_v36 = vpop.f32.mrb[25].mxu1 }
 0x220   : > { %v897_v37 = vadd.f32 %v896_v36, %v2096_v17  ;;  %v898_v38 = vpop.f32.mrb[26].mxu1  ;;  %1168 = vmatprep.mubr.bf16.mxu0 %v956_v33 }
 0x221   : > { %v899_v39 = vadd.f32 %v898_v38, %v2092_v9  ;;  %v900_v40 = vpop.f32.mrb[27].mxu1  ;;  %1169 = vmatmul.mubr.bf16.gmra.mrb[52].mxu0 %v955_v32  ;;  %v937_v42 = vmax.f32 %v895_v35, 0.0 }
 0x222   : > { %v901_v41 = vadd.f32 %v900_v40, %v2096_v17  ;;  %v938_v44 = vmax.f32 %v897_v37, 0.0 }
 0x223   : > { %v939_v43 = vmax.f32 %v899_v39, 0.0 }
 0x224   : > { %v940_v45 = vmax.f32 %v901_v41, 0.0 }
 0x225   : > { %v957_v46 = vpack.c.bf16 %v939_v43, %v937_v42 }
 0x226   : > { %v958_v47 = vpack.c.bf16 %v940_v45, %v938_v44  ;;  %v904_v48 = vpop.f32.mrb[28].mxu1 }
 0x227   : > { %v905_v49 = vadd.f32 %v904_v48, %v2092_v9  ;;  %v906_v50 = vpop.f32.mrb[29].mxu1 }
 0x228   : > { %v907_v51 = vadd.f32 %v906_v50, %v2096_v17  ;;  %v908_v52 = vpop.f32.mrb[30].mxu1  ;;  %1176 = vmatprep.mubr.bf16.mxu0 %v958_v47 }
 0x229   : > { %v909_v53 = vadd.f32 %v908_v52, %v2092_v9  ;;  %v910_v54 = vpop.f32.mrb[31].mxu1  ;;  %1177 = vmatmul.mubr.bf16.gmra.mrb[56].mxu0 %v957_v46  ;;  %v941_v56 = vmax.f32 %v905_v49, 0.0 }
 0x22a   : > { %v911_v55 = vadd.f32 %v910_v54, %v2096_v17  ;;  %v942_v58 = vmax.f32 %v907_v51, 0.0 }
 0x22b   : > { %v943_v57 = vmax.f32 %v909_v53, 0.0 }
 0x22c   : > { %v944_v59 = vmax.f32 %v911_v55, 0.0 }
 0x22d   : > { %v959_v60 = vpack.c.bf16 %v943_v57, %v941_v56 }
 0x22e   : > { %v960_v61 = vpack.c.bf16 %v944_v59, %v942_v58 }
 0x230   : > { %1184 = vmatprep.mubr.bf16.mxu0 %v960_v61 }
 0x231   : > { %1185 = vmatmul.mubr.bf16.gmra.mrb[60].mxu0 %v959_v60 }
 0x2cc   : > { %v1453_v62 = vpop.f32.mrb[32].mxu0 }
 0x2cd   : > { %v1454_v9 = vpop.f32.mrb[33].mxu0 }
 0x2ce   : > { %v1455_v0 = vadd.f32 %v1454_v9, %v1453_v62  ;;  %v1456_v1 = vpop.f32.mrb[34].mxu0 }
 0x2cf   : > { %v1457_v2 = vpop.f32.mrb[35].mxu0 }
 0x2d0   : > { %v1131_v17 = vadd.f32 %v1455_v0, %v2133_v63  ;;  %v1458_v3 = vadd.f32 %v1457_v2, %v1456_v1 }
 0x2d2   : > { %1626 = vtanh.f32 %v1131_v17  ;;  %v1134_v4 = vadd.f32 %v1458_v3, %v2133_v63 }
 0x2d4   : > { %1628 = vtanh.f32 %v1134_v4  ;;  %v1459_v5 = vpop.f32.mrb[36].mxu0 }
 0x2d5   : > { %v1460_v6 = vpop.f32.mrb[37].mxu0 }
 0x2d6   : > { %v1461_v7 = vadd.f32 %v1460_v6, %v1459_v5  ;;  %v1462_v8 = vpop.f32.mrb[38].mxu0 }
 0x2d7   : > { %v1463_v16 = vpop.f32.mrb[39].mxu0 }
 0x2d8   : > { %v1139_v10 = vadd.f32 %v1461_v7, %v2133_v63  ;;  %v1464_v11 = vadd.f32 %v1463_v16, %v1462_v8 }
 0x2da   : > { %1630 = vtanh.f32 %v1139_v10  ;;  %v1142_v18 = vadd.f32 %v1464_v11, %v2133_v63 }
 0x2dc   : > { %v1627_v19 = vpop.eup %1626  ;;  %1632 = vtanh.f32 %v1142_v18  ;;  %v1465_v21 = vpop.f32.mrb[40].mxu0 }
 0x2dd   : > { %v1216_v22 = vmul.f32 %v1627_v19, %v2142_v14  ;;  %v1466_v23 = vpop.f32.mrb[41].mxu0 }
 0x2de   : > { %v1629_v24 = vpop.eup %1628  ;;  %v1467_v13 = vadd.f32 %v1466_v23, %v1465_v21  ;;  %v1468_v25 = vpop.f32.mrb[42].mxu0 }
 0x2df   : > { %v1239_v26 = vadd.f32 %v2150_v20, %v1216_v22  ;;  %v1217_v12 = vmul.f32 %v1629_v24, %v2142_v14  ;;  %v1469_v15 = vpop.f32.mrb[43].mxu0 }
 0x2e0   : > { %v1147_v27 = vadd.f32 %v1467_v13, %v2133_v63  ;;  %v1470_v28 = vadd.f32 %v1469_v15, %v1468_v25 }
 0x2e1   : > { %1255 = vst [vmem:[%s2156_s26] sm:$0xff] %v1239_v26  ;;  %v1240_v29 = vadd.f32 %v2150_v20, %v1217_v12 }
 0x2e2   : > { %1634 = vtanh.f32 %v1147_v27  ;;  %v1150_v30 = vadd.f32 %v1470_v28, %v2133_v63 }
 0x2e3   : > { %1256 = vst [vmem:[%s2156_s26 + $0x8] sm:$0xff] %v1240_v29 }
 0x2e4   : > { %v1631_v31 = vpop.eup %1630  ;;  %1636 = vtanh.f32 %v1150_v30  ;;  %v1471_v32 = vpop.f32.mrb[44].mxu0 }
 0x2e5   : > { %v1218_v33 = vmul.f32 %v1631_v31, %v2142_v14  ;;  %v1472_v34 = vpop.f32.mrb[45].mxu0 }
 0x2e6   : > { %v1633_v35 = vpop.eup %1632  ;;  %v1473_v36 = vadd.f32 %v1472_v34, %v1471_v32  ;;  %v1474_v37 = vpop.f32.mrb[46].mxu0 }
 0x2e7   : > { %v1241_v38 = vadd.f32 %v2150_v20, %v1218_v33  ;;  %v1219_v39 = vmul.f32 %v1633_v35, %v2142_v14  ;;  %v1475_v40 = vpop.f32.mrb[47].mxu0 }
 0x2e8   : > { %v1155_v41 = vadd.f32 %v1473_v36, %v2133_v63  ;;  %v1476_v42 = vadd.f32 %v1475_v40, %v1474_v37 }
 0x2e9   : > { %1257 = vst [vmem:[%s2156_s26 + $0x10] sm:$0xff] %v1241_v38  ;;  %v1242_v43 = vadd.f32 %v2150_v20, %v1219_v39 }
 0x2ea   : > { %1638 = vtanh.f32 %v1155_v41  ;;  %v1158_v44 = vadd.f32 %v1476_v42, %v2133_v63 }
 0x2eb   : > { %1258 = vst [vmem:[%s2156_s26 + $0x18] sm:$0xff] %v1242_v43 }
 0x2ec   : > { %v1635_v45 = vpop.eup %1634  ;;  %1640 = vtanh.f32 %v1158_v44  ;;  %v1477_v46 = vpop.f32.mrb[48].mxu0 }
 0x2ed   : > { %v1220_v47 = vmul.f32 %v1635_v45, %v2142_v14  ;;  %v1478_v48 = vpop.f32.mrb[49].mxu0 }
 0x2ee   : > { %v1637_v49 = vpop.eup %1636  ;;  %v1479_v50 = vadd.f32 %v1478_v48, %v1477_v46  ;;  %v1480_v51 = vpop.f32.mrb[50].mxu0 }
 0x2ef   : > { %v1243_v52 = vadd.f32 %v2150_v20, %v1220_v47  ;;  %v1221_v53 = vmul.f32 %v1637_v49, %v2142_v14  ;;  %v1481_v54 = vpop.f32.mrb[51].mxu0 }
 0x2f0   : > { %v1163_v55 = vadd.f32 %v1479_v50, %v2133_v63  ;;  %v1482_v56 = vadd.f32 %v1481_v54, %v1480_v51 }
 0x2f1   : > { %1259 = vst [vmem:[%s2156_s26 + $0x20] sm:$0xff] %v1243_v52  ;;  %v1244_v57 = vadd.f32 %v2150_v20, %v1221_v53 }
 0x2f2   : > { %1642 = vtanh.f32 %v1163_v55  ;;  %v1166_v58 = vadd.f32 %v1482_v56, %v2133_v63 }
 0x2f3   : > { %1260 = vst [vmem:[%s2156_s26 + $0x28] sm:$0xff] %v1244_v57 }
 0x2f4   : > { %v1639_v59 = vpop.eup %1638  ;;  %1644 = vtanh.f32 %v1166_v58  ;;  %v1483_v60 = vpop.f32.mrb[52].mxu0 }
 0x2f5   : > { %v1222_v61 = vmul.f32 %v1639_v59, %v2142_v14  ;;  %v1484_v62 = vpop.f32.mrb[53].mxu0 }
 0x2f6   : > { %v1641_v9 = vpop.eup %1640  ;;  %v1485_v0 = vadd.f32 %v1484_v62, %v1483_v60  ;;  %v1486_v1 = vpop.f32.mrb[54].mxu0 }
 0x2f7   : > { %v1245_v2 = vadd.f32 %v2150_v20, %v1222_v61  ;;  %v1223_v17 = vmul.f32 %v1641_v9, %v2142_v14  ;;  %v1487_v3 = vpop.f32.mrb[55].mxu0 }
 0x2f8   : > { %v1171_v4 = vadd.f32 %v1485_v0, %v2133_v63  ;;  %v1488_v5 = vadd.f32 %v1487_v3, %v1486_v1 }
 0x2f9   : > { %1261 = vst [vmem:[%s2156_s26 + $0x30] sm:$0xff] %v1245_v2  ;;  %v1246_v6 = vadd.f32 %v2150_v20, %v1223_v17 }
 0x2fa   : > { %1646 = vtanh.f32 %v1171_v4  ;;  %v1174_v7 = vadd.f32 %v1488_v5, %v2133_v63 }
 0x2fb   : > { %1262 = vst [vmem:[%s2156_s26 + $0x38] sm:$0xff] %v1246_v6 }
 0x2fc   : > { %v1643_v8 = vpop.eup %1642  ;;  %1648 = vtanh.f32 %v1174_v7  ;;  %v1489_v16 = vpop.f32.mrb[56].mxu0 }
 0x2fd   : > { %v1224_v10 = vmul.f32 %v1643_v8, %v2142_v14  ;;  %v1490_v11 = vpop.f32.mrb[57].mxu0 }
 0x2fe   : > { %v1645_v18 = vpop.eup %1644  ;;  %v1491_v19 = vadd.f32 %v1490_v11, %v1489_v16  ;;  %v1492_v21 = vpop.f32.mrb[58].mxu0 }
 0x2ff   : > { %v1247_v22 = vadd.f32 %v2150_v20, %v1224_v10  ;;  %v1225_v23 = vmul.f32 %v1645_v18, %v2142_v14  ;;  %v1493_v24 = vpop.f32.mrb[59].mxu0 }
 0x300   : > { %v1179_v13 = vadd.f32 %v1491_v19, %v2133_v63  ;;  %v1494_v25 = vadd.f32 %v1493_v24, %v1492_v21 }
 0x301   : > { %1263 = vst [vmem:[%s2156_s26 + $0x40] sm:$0xff] %v1247_v22  ;;  %v1248_v26 = vadd.f32 %v2150_v20, %v1225_v23 }
 0x302   : > { %1650 = vtanh.f32 %v1179_v13  ;;  %v1182_v12 = vadd.f32 %v1494_v25, %v2133_v63 }
 0x303   : > { %1264 = vst [vmem:[%s2156_s26 + $0x48] sm:$0xff] %v1248_v26 }
 0x304   : > { %v1647_v15 = vpop.eup %1646  ;;  %1652 = vtanh.f32 %v1182_v12  ;;  %v1495_v27 = vpop.f32.mrb[60].mxu0 }
 0x305   : > { %v1226_v28 = vmul.f32 %v1647_v15, %v2142_v14  ;;  %v1496_v29 = vpop.f32.mrb[61].mxu0 }
 0x306   : > { %v1649_v30 = vpop.eup %1648  ;;  %v1497_v31 = vadd.f32 %v1496_v29, %v1495_v27  ;;  %v1498_v32 = vpop.f32.mrb[62].mxu0 }
 0x307   : > { %v1249_v33 = vadd.f32 %v2150_v20, %v1226_v28  ;;  %v1227_v34 = vmul.f32 %v1649_v30, %v2142_v14  ;;  %v1499_v35 = vpop.f32.mrb[63].mxu0 }
 0x308   : > { %v1187_v36 = vadd.f32 %v1497_v31, %v2133_v63  ;;  %v1500_v37 = vadd.f32 %v1499_v35, %v1498_v32 }
 0x309   : > { %1265 = vst [vmem:[%s2156_s26 + $0x50] sm:$0xff] %v1249_v33  ;;  %v1250_v38 = vadd.f32 %v2150_v20, %v1227_v34 }
 0x30a   : > { %1654 = vtanh.f32 %v1187_v36  ;;  %v1190_v39 = vadd.f32 %v1500_v37, %v2133_v63 }
 0x30b   : > { %1266 = vst [vmem:[%s2156_s26 + $0x58] sm:$0xff] %v1250_v38 }
 0x30c   : > { %v1651_v40 = vpop.eup %1650  ;;  %1656 = vtanh.f32 %v1190_v39 }
 0x30d   : > { %v1228_v41 = vmul.f32 %v1651_v40, %v2142_v14 }
 0x30e   : > { %v1653_v42 = vpop.eup %1652 }
 0x30f   : > { %v1251_v43 = vadd.f32 %v2150_v20, %v1228_v41  ;;  %v1229_v44 = vmul.f32 %v1653_v42, %v2142_v14 }
 0x311   : > { %1267 = vst [vmem:[%s2156_s26 + $0x60] sm:$0xff] %v1251_v43  ;;  %v1252_v45 = vadd.f32 %v2150_v20, %v1229_v44 }
 0x313   : > { %1268 = vst [vmem:[%s2156_s26 + $0x68] sm:$0xff] %v1252_v45 }
 0x314   : > { %v1655_v46 = vpop.eup %1654 }
 0x315   : > { %v1230_v63 = vmul.f32 %v1655_v46, %v2142_v14 }
 0x316   : > { %v1657_v47 = vpop.eup %1656 }
 0x317   : > { %v1253_v48 = vadd.f32 %v2150_v20, %v1230_v63  ;;  %v1231_v49 = vmul.f32 %v1657_v47, %v2142_v14 }
 0x319   : > { %1269 = vst [vmem:[%s2156_s26 + $0x70] sm:$0xff] %v1253_v48  ;;  %v1254_v50 = vadd.f32 %v2150_v20, %v1231_v49 }
 0x31b   : > { %1270 = vst [vmem:[%s2156_s26 + $0x78] sm:$0xff] %v1254_v50 }
 0x31c   : > { %1699 = shalt.err (!%p1696_p7)
}
 0x31d   : > { %s1700_s21 = scalar_lea.hbm %s2216_s14, 2048  ;;  %s1704_s28 = scalar_lea.hbm %s2275_s9, 4096 }
 0x31e   : > { %p1701_p8 = scmp.ne.s32.totalorder %s2216_s14, %s1700_s21  ;;  %p1705_p1 = scmp.lt.u32.totalorder %s2216_s14, %s2275_s9 }
 0x31f   : > { %p1706_p0 = scmp.lt.u32.totalorder %s1704_s28, %s1700_s21  ;;  %p1708_p6 = scmp.lt.u32.totalorder %s1700_s21, %s2216_s14 }
 0x320   : > { %p1702_p11 = pnand %p1701_p8, %p2286_p9 }
 0x321   : > { %p1707_p5 = por %p1706_p0, %p1705_p1 }
 0x322   : > { %p1703_p13 = pneg %p1702_p11 }
 0x323   : > { %p1709_p10 = por %p1708_p6, %p1707_p5 }
 0x325   : > { %p1710_p12 = pnand %p1709_p10, %p1703_p13 }
 0x327   : > { %1713 = shalt.err (!%p1710_p12)
}
 0x328   : > { %s1759_s23 = smov 128   ;;  %s1760_s16 = smov 8  }
 0x329   : > { %1505 = dma.vmem_to_hbm [thread:$0]  (%p2286_p9), %s2218_s27, 2048, %s2216_s14, %s2225_s13, %s1759_s23, %s1759_s23, %s1760_s16  }
 0x32a PF: > { %p1517_p2 = scmp.ge.s32.totalorder %s1752_s12, 2  ;;  %s1300_s17 = sand.u32 1, %s1740_s30  }
 0x32b   : > { %p2287_p3 = scmp.ne.s32.totalorder %s2280_s20, 0  ;;  %s1301_s22 = scalar_lea.sflag [#allocation4], %s1300_s17 }
 0x32d   : > { %p1512_p4 = pnand %p1517_p2, %p2287_p3 }
 0x32f   : > { %1735 = dma.done.wait (!%p1512_p4), %s1301_s22, 2048  }
 0x330   : > { %1737 = vsyncadd (!%p1512_p4), %s1301_s22, 4294965248  ;;  %p20_p7 = scmp.ge.s32.totalorder %s1836_s15, 4   ;;  %s2288_s30 = smov %s1744_s10 }
 0x331   : > { %s2289_s10 = smov %s1748_s11  ;;  %s2290_s11 = smov %s1847_s18 }
 0x332   : > { %s2291_s12 = smov %s1836_s15  ;;  %22 = sbr.rel (!%p20_p7) target bundleno = 4 (0x4), region = 96 }
 0x339   :  { %1306 = vsyncpa [#allocation3], 1 }
 0x33a   :  { %1308 = vsyncpa [#allocation3 + $0x1], 1 }
 0x33b   :  { %1309 = vsyncpa [#allocation4], 1 }
 0x33c   :  { %1311 = vsyncpa [#allocation4 + $0x1], 1 }

</bundles_post_ra>
